<compile_context>
chip_gen: v7x
topology: tpu7x:2x2x1
jax: 0.10.0
libtpu: 0.0.40
codegen_flags: <defaults>
</compile_context>

<pallas_src>
import jax
import jax.numpy as jnp
from jax.experimental import pallas as pl
from jax.experimental.pallas import tpu as pltpu

N_PAD = 8            # padded action dimension (>= n_actions, sublane-friendly)
NEG_INF = -1e30      # bias fill for padded action lanes -> exp() underflows to 0
TB_MAX = 2048        # max batch-tile rows (few MiB of double-buffered VMEM)


def policy_net_kernel(x_ref, w1_ref, b1_ref, w2_ref, b2_ref, out_ref):
    # x_ref:  (TB, n_states)            f32
    # w1_ref: (n_states, n_hidden)      bf16
    # b1_ref: (1, n_hidden)             f32
    # w2_ref: (n_hidden, N_PAD)         bf16  (padded columns = 0)
    # b2_ref: (1, N_PAD)                f32   (padded lanes = NEG_INF)
    # out_ref:(TB, N_PAD)               f32   (padded lanes come out as exact 0)
    x = x_ref[...].astype(jnp.bfloat16)

    # affine1 + ReLU: bf16 MXU matmul, f32 accumulate, f32 bias/ReLU.
    h = jnp.dot(x, w1_ref[...], preferred_element_type=jnp.float32) + b1_ref[...]
    h = jnp.maximum(h, 0.0)

    # affine2 on the zero-padded bf16 weight (N = N_PAD).
    s = (jnp.dot(h.astype(jnp.bfloat16), w2_ref[...],
                 preferred_element_type=jnp.float32) + b2_ref[...])

    # Numerically-stable softmax over action lanes; padded lanes hold NEG_INF
    # so exp(s - m) is exactly 0 there and they do not perturb the row sum.
    m = jnp.max(s, axis=1, keepdims=True)
    e = jnp.exp(s - m)
    denom = jnp.sum(e, axis=1, keepdims=True)
    # Exact division (not approx reciprocal): rows sum to 1 to f32 precision,
    # which matters for downstream log-prob / policy-gradient terms.
    out_ref[...] = (e / denom).astype(out_ref.dtype)


def _round_up(x, m):
    return (x + m - 1) // m * m


def policy_net_forward(x, w1_kl, b1_kl, w2_kl, b2_kl, n_actions):
    """Forward pass. Params must already be in kernel layout (see init_params):
         w1_kl: (n_states, n_hidden) bf16    b1_kl: (1, n_hidden) f32
         w2_kl: (n_hidden, N_PAD)   bf16     b2_kl: (1, N_PAD)    f32
    Returns (B, n_actions) float32 softmax probabilities."""
    B, n_states = x.shape
    n_hidden = w1_kl.shape[1]

    # Pad the batch only to a sublane multiple (<= 7 extra rows).
    B_pad = _round_up(B, 8)
    if B_pad != B:
        x = jnp.pad(x, ((0, B_pad - B), (0, 0)))

    # Batch tiling:
    #  * tiny batches            -> one tile (grid-step overhead dominates anyway)
    #  * everything else         -> >=2 parallel grid steps (v7x has 2 TCs),
    #                               capped at TB_MAX rows per tile; a partial
    #                               last tile is handled by pl.cdiv.
    if B_pad <= 256:
        TB = B_pad
    else:
        TB = min(TB_MAX, _round_up(pl.cdiv(B_pad, 2), 8))
    grid = (pl.cdiv(B_pad, TB),)

    flops = 2 * B_pad * n_states * n_hidden + 2 * B_pad * n_hidden * N_PAD
    bytes_accessed = (4 * B_pad * n_states                       # x in
                      + 2 * (n_states * n_hidden + n_hidden * N_PAD)  # bf16 weights
                      + 4 * (n_hidden + N_PAD)                   # f32 biases
                      + 4 * B_pad * N_PAD)                       # out
    cost = pl.CostEstimate(flops=flops,
                           transcendentals=B_pad * N_PAD,
                           bytes_accessed=bytes_accessed)

    out_padded = pl.pallas_call(
        policy_net_kernel,
        out_shape=jax.ShapeDtypeStruct((B_pad, N_PAD), jnp.float32),
        grid=grid,
        in_specs=[
            pl.BlockSpec((TB, n_states), lambda i: (i, 0)),
            pl.BlockSpec((n_states, n_hidden), lambda i: (0, 0)),
            pl.BlockSpec((1, n_hidden), lambda i: (0, 0)),
            pl.BlockSpec((n_hidden, N_PAD), lambda i: (0, 0)),
            pl.BlockSpec((1, N_PAD), lambda i: (0, 0)),
        ],
        out_specs=pl.BlockSpec((TB, N_PAD), lambda i: (i, 0)),
        compiler_params=pltpu.CompilerParams(
            dimension_semantics=("parallel",),
            # Explicit limit with headroom for v7x (64 MiB physical VMEM);
            # current tiles only need a few MiB even at TB_MAX.
            vmem_limit_bytes=48 * 1024 * 1024),
        cost_estimate=cost,
    )(x, w1_kl, b1_kl, w2_kl, b2_kl)

    # Strip batch padding and the padded action lanes (cheap XLA slice).
    return out_padded[:B, :n_actions]


def init_params(key, n_states, n_actions, n_hidden=128):
    """PyTorch nn.Linear-style init (uniform +-1/sqrt(fan_in)).
    Returns (pytorch_layout_params, kernel_layout_params); the one-time layout
    conversion (transpose + lane padding + bf16 weight cast) happens here,
    out of the hot loop."""
    assert n_actions <= N_PAD
    k1, k2, k3, k4 = jax.random.split(key, 4)
    bound1 = 1.0 / jnp.sqrt(n_states)
    bound2 = 1.0 / jnp.sqrt(n_hidden)
    w1 = jax.random.uniform(k1, (n_hidden, n_states), jnp.float32, -bound1, bound1)
    b1 = jax.random.uniform(k2, (n_hidden,), jnp.float32, -bound1, bound1)
    w2 = jax.random.uniform(k3, (n_actions, n_hidden), jnp.float32, -bound2, bound2)
    b2 = jax.random.uniform(k4, (n_actions,), jnp.float32, -bound2, bound2)

    # Kernel layout: (in, out) bf16 weights; second projection zero-padded to
    # N_PAD columns, with NEG_INF bias in the padded lanes to mask them in the
    # softmax. Biases stay f32 (added after the f32-accumulated matmul).
    w1_kl = w1.T.astype(jnp.bfloat16)                              # (n_states, n_hidden)
    b1_kl = b1.reshape(1, n_hidden)
    w2_kl = (jnp.zeros((n_hidden, N_PAD), jnp.bfloat16)
             .at[:, :n_actions].set(w2.T.astype(jnp.bfloat16)))    # (n_hidden, N_PAD)
    b2_kl = jnp.full((1, N_PAD), NEG_INF, jnp.float32).at[0, :n_actions].set(b2)

    return (w1, b1, w2, b2), (w1_kl, b1_kl, w2_kl, b2_kl)


if __name__ == "__main__":
    # Small shapes consistent with the module (CartPole-like policy net).
    B, n_states, n_actions, n_hidden = 8, 4, 2, 128

    key = jax.random.PRNGKey(0)
    kx, kp = jax.random.split(key)
    x = jax.random.normal(kx, (B, n_states), dtype=jnp.float32)

    (w1, b1, w2, b2), kernel_params = init_params(kp, n_states, n_actions, n_hidden)

    out = policy_net_forward(x, *kernel_params, n_actions)
    out = jax.block_until_ready(out)

    # Reference in plain f32 JAX (PyTorch-layout weights).
    h_ref = jnp.maximum(x @ w1.T + b1, 0.0)
    s_ref = h_ref @ w2.T + b2
    ref = jax.nn.softmax(s_ref, axis=1)

    assert out.shape == (B, n_actions)
    # bf16 MXU operands (f32 accumulation) -> probabilities agree to ~1e-2.
    assert jnp.allclose(out, ref, atol=2e-2, rtol=2e-2), float(jnp.max(jnp.abs(out - ref)))
    # Exact division in the kernel: rows sum to 1 to f32 precision.
    assert jnp.allclose(jnp.sum(out, axis=1), 1.0, atol=1e-5)

    print("KERNEL_OK")
</pallas_src>

<mosaic_0001>
module attributes {stable_mosaic.version = 11 : i64} {
  func.func @policy_net_kernel(%arg0: i32, %arg1: memref<8x4xf32, #tpu.memory_space<vmem>>, %arg2: memref<4x128xbf16, #tpu.memory_space<vmem>>, %arg3: memref<1x128xf32, #tpu.memory_space<vmem>>, %arg4: memref<128x8xbf16, #tpu.memory_space<vmem>>, %arg5: memref<1x8xf32, #tpu.memory_space<vmem>>, %arg6: memref<8x8xf32, #tpu.memory_space<vmem>>) attributes {dimension_semantics = [#tpu.dimension_semantics<parallel>], iteration_bounds = array<i64: 1>, scalar_prefetch = 0 : i64, scratch_operands = 0 : i64, tpu.core_type = #tpu.core_type<tc>, window_params = [{transform_indices = @transform_0, window_bounds = array<i64: 8, 4>}, {pipeline_mode = #tpu.pipeline_mode<synchronous>, transform_indices = @transform_1, window_bounds = array<i64: 4, 128>}, {pipeline_mode = #tpu.pipeline_mode<synchronous>, transform_indices = @transform_2, window_bounds = array<i64: 1, 128>}, {pipeline_mode = #tpu.pipeline_mode<synchronous>, transform_indices = @transform_3, window_bounds = array<i64: 128, 8>}, {pipeline_mode = #tpu.pipeline_mode<synchronous>, transform_indices = @transform_4, window_bounds = array<i64: 1, 8>}, {transform_indices = @transform_5, window_bounds = array<i64: 8, 8>}]} {
    %c0 = arith.constant 0 : index
    %c0_0 = arith.constant 0 : index
    %0 = vector.load %arg1[%c0, %c0_0] : memref<8x4xf32, #tpu.memory_space<vmem>>, vector<8x4xf32>
    %1 = arith.truncf %0 : vector<8x4xf32> to vector<8x4xbf16>
    %c0_1 = arith.constant 0 : index
    %c0_2 = arith.constant 0 : index
    %2 = vector.load %arg2[%c0_1, %c0_2] : memref<4x128xbf16, #tpu.memory_space<vmem>>, vector<4x128xbf16>
    %cst = arith.constant dense<0.000000e+00> : vector<8x128xf32>
    %3 = tpu.matmul %1, %2, %cst {dimension_numbers = #tpu.dot_dimension_numbers<[1], [0], [0], [1], [0, 0, 1, 1], [], []>} : vector<8x4xbf16>, vector<4x128xbf16>, vector<8x128xf32> -> vector<8x128xf32>
    %c0_3 = arith.constant 0 : index
    %c0_4 = arith.constant 0 : index
    %4 = vector.load %arg3[%c0_3, %c0_4] : memref<1x128xf32, #tpu.memory_space<vmem>>, vector<1x128xf32>
    %5 = vector.broadcast %4 : vector<1x128xf32> to vector<8x128xf32>
    %6 = arith.addf %3, %5 : vector<8x128xf32>
    %cst_5 = arith.constant 0.000000e+00 : f32
    %7 = vector.broadcast %cst_5 : f32 to vector<8x128xf32>
    %8 = arith.maximumf %6, %7 : vector<8x128xf32>
    %9 = arith.truncf %8 : vector<8x128xf32> to vector<8x128xbf16>
    %c0_6 = arith.constant 0 : index
    %c0_7 = arith.constant 0 : index
    %10 = vector.load %arg4[%c0_6, %c0_7] : memref<128x8xbf16, #tpu.memory_space<vmem>>, vector<128x8xbf16>
    %cst_8 = arith.constant dense<0.000000e+00> : vector<8x8xf32>
    %11 = tpu.matmul %9, %10, %cst_8 {dimension_numbers = #tpu.dot_dimension_numbers<[1], [0], [0], [1], [0, 0, 1, 1], [], []>} : vector<8x128xbf16>, vector<128x8xbf16>, vector<8x8xf32> -> vector<8x8xf32>
    %c0_9 = arith.constant 0 : index
    %c0_10 = arith.constant 0 : index
    %12 = vector.load %arg5[%c0_9, %c0_10] : memref<1x8xf32, #tpu.memory_space<vmem>>, vector<1x8xf32>
    %13 = vector.broadcast %12 : vector<1x8xf32> to vector<8x8xf32>
    %14 = arith.addf %11, %13 : vector<8x8xf32>
    %cst_11 = arith.constant dense<0xFF800000> : vector<8xf32>
    %15 = vector.multi_reduction <maximumf>, %14, %cst_11 [1] : vector<8x8xf32> to vector<8xf32>
    %16 = vector.shape_cast %15 : vector<8xf32> to vector<8x1xf32>
    %17 = vector.broadcast %16 : vector<8x1xf32> to vector<8x8xf32>
    %18 = arith.subf %14, %17 : vector<8x8xf32>
    %19 = math.exp %18 : vector<8x8xf32>
    %cst_12 = arith.constant dense<0.000000e+00> : vector<8xf32>
    %20 = vector.multi_reduction <add>, %19, %cst_12 [1] : vector<8x8xf32> to vector<8xf32>
    %21 = vector.shape_cast %20 : vector<8xf32> to vector<8x1xf32>
    %22 = vector.broadcast %21 : vector<8x1xf32> to vector<8x8xf32>
    %23 = arith.divf %19, %22 : vector<8x8xf32>
    %c0_13 = arith.constant 0 : index
    %c0_14 = arith.constant 0 : index
    %24 = vector.load %arg6[%c0_13, %c0_14] : memref<8x8xf32, #tpu.memory_space<vmem>>, vector<8x8xf32>
    tpu.vector_store %arg6[%c0_13, %c0_14], %23 {strides = array<i32>} : memref<8x8xf32, #tpu.memory_space<vmem>>, vector<8x8xf32>,
    return
  }
  func.func @transform_0(%arg0: i32) -> (i32, i32) {
    %c0_i32 = arith.constant 0 : i32
    %c0_i32_0 = arith.constant 0 : i32
    return %arg0, %c0_i32 : i32, i32
  }
  func.func @transform_1(%arg0: i32) -> (i32, i32) {
    %c0_i32 = arith.constant 0 : i32
    %c0_i32_0 = arith.constant 0 : i32
    %c0_i32_1 = arith.constant 0 : i32
    return %c0_i32, %c0_i32_0 : i32, i32
  }
  func.func @transform_2(%arg0: i32) -> (i32, i32) {
    %c0_i32 = arith.constant 0 : i32
    %c0_i32_0 = arith.constant 0 : i32
    %c0_i32_1 = arith.constant 0 : i32
    return %c0_i32, %c0_i32_0 : i32, i32
  }
  func.func @transform_3(%arg0: i32) -> (i32, i32) {
    %c0_i32 = arith.constant 0 : i32
    %c0_i32_0 = arith.constant 0 : i32
    %c0_i32_1 = arith.constant 0 : i32
    return %c0_i32, %c0_i32_0 : i32, i32
  }
  func.func @transform_4(%arg0: i32) -> (i32, i32) {
    %c0_i32 = arith.constant 0 : i32
    %c0_i32_0 = arith.constant 0 : i32
    %c0_i32_1 = arith.constant 0 : i32
    return %c0_i32, %c0_i32_0 : i32, i32
  }
  func.func @transform_5(%arg0: i32) -> (i32, i32) {
    %c0_i32 = arith.constant 0 : i32
    %c0_i32_0 = arith.constant 0 : i32
    return %arg0, %c0_i32 : i32, i32
  }
}

</mosaic_0001>

<bundles_post_ra>
// kernel: tpu_custom_call.1
= control target key start
LH: loop header
LB: loop body
LE: loop exit
PB: predicated region body
PF: predicated region fallthrough
CT: control target
= control target key end

     0   :  { %vm36_vm0 = vcmask 1041408   ;;  %v307_v2 = vmov 0.0   ;;  %vm308_vm1 = vmmov 0   ;;  %vm32_vm2 = vcmask 31744   ;;  %s391_s0 = inlined_call_operand.vmem [shape: f32[8,4], index: 0, kind: input, shape index: {}]   ;;  %s392_s1 = inlined_call_operand.vmem [shape: bf16[4,128], index: 1, kind: input, shape index: {}]   ;;  %s393_s2 = inlined_call_operand.vmem [shape: f32[1,128], index: 2, kind: input, shape index: {}]   ;;  %s394_s3 = inlined_call_operand.vmem [shape: bf16[128,8], index: 3, kind: input, shape index: {}]   ;;  %s395_s4 = inlined_call_operand.vmem [shape: f32[1,8], index: 4, kind: input, shape index: {}]   ;;  %s396_s5 = inlined_call_operand.hbm [shape: f32[8,8], index: 5, kind: output, shape index: {}]  }
   0x1   :  { %v24_v0 = vld [vmem:[%s392_s1] sm:$0x3]  ;;  %242 = vmatprep.subr.bf16.mxu0 %v307_v2  ;;  %244 = vmatprep.mubr.msk.bf16.mxu0 %vm308_vm1, %v307_v2  ;;  %v272_v6 = vld [vmem:[%s394_s3 + $0x8] sm:$0xff]   ;;  %v273_v7 = vld [vmem:[%s394_s3 + $0x10] sm:$0xff]  }
   0x2   :  { %v22_v1 = vld [vmem:[%s391_s0] sm:$0xff]  ;;  %v38_v3 = vsel %vm36_vm0, %v24_v0, 0  ;;  %248 = vmatprep.subr.bf16.mxu1 %v307_v2  ;;  %264 = vmatprep.mubr.msk.bf16.mxu1 %vm308_vm1, %v307_v2 }
   0x3   :  { %v23_v4 = vpack.c.bf16 %v22_v1, %v22_v1  ;;  %243 = vmatpush3.bf16.msra.mxu0 %v38_v3  ;;  %v271_v5 = vld [vmem:[%s394_s3] sm:$0xff]  }
   0x4   :  { %249 = vmatpush3.bf16.msra.mxu1 %v271_v5 }
   0x5   :  { %250 = vmatprep.subr.bf16.mxu1 %v307_v2 }
   0x6   :  { %245 = vmatmul.mubr.msk.bf16.vlgmr.msra.gmra.mrb[0].mxu0 %vm32_vm2, %v23_v4 }
   0x8   :  { %251 = vmatpush3.bf16.msra.mxu1 %v272_v6 }
   0x9   :  { %252 = vmatprep.subr.bf16.mxu1 %v307_v2 }
   0xa   :  { %10 = vsyncpa [#allocation3], 0  ;;  %v274_v8 = vld [vmem:[%s394_s3 + $0x18] sm:$0xff]   ;;  %v275_v9 = vld [vmem:[%s394_s3 + $0x20] sm:$0xff]   ;;  %vm193_vm3 = vcmask 64512  }
   0xb   :  { %v276_v10 = vld [vmem:[%s394_s3 + $0x28] sm:$0xff]   ;;  %v277_v11 = vld [vmem:[%s394_s3 + $0x30] sm:$0xff]   ;;  %v278_v12 = vld [vmem:[%s394_s3 + $0x38] sm:$0xff]  }
   0xc   :  { %253 = vmatpush3.bf16.msra.mxu1 %v273_v7  ;;  %v220_v13 = vld [vmem:[%s393_s2] ss:$0 sm:$0xff]  ;;  %s309_s2 = smov [#allocation2]  }
   0xd   :  { %254 = vmatprep.subr.bf16.mxu1 %v307_v2  ;;  %v222_v21 = vld [vmem:[%s395_s4] ss:$0 sm:$0xff]  ;;  %s212_s3 = sshll.u32 %s309_s2, 4  ;;  %s213_s3 = int_to_ptr.vmem [resolvable:$true] %s212_s3 }
   0xe   :  { %s283_s4 = scalar_lea.vmem %s213_s3, 128  ;;  %p288_p1 = scmp.lt.s32.totalorder %s213_s3, %s213_s3 }
   0xf   :  { %p284_p0 = scmp.ne.s32.totalorder %s213_s3, %s283_s4  ;;  %p289_p2 = scmp.lt.s32.totalorder %s283_s4, %s283_s4 }
  0x10   :  { %255 = vmatpush3.bf16.msra.mxu1 %v274_v8 }
  0x11   :  { %256 = vmatprep.subr.bf16.mxu1 %v307_v2  ;;  %p290_p3 = por %p289_p2, %p288_p1 }
  0x13   :  { %p291_p4 = pnand %p290_p3, %p284_p0 }
  0x14   :  { %257 = vmatpush3.bf16.msra.mxu1 %v275_v9 }
  0x15   :  { %258 = vmatprep.subr.bf16.mxu1 %v307_v2 }
  0x18   :  { %259 = vmatpush3.bf16.msra.mxu1 %v276_v10 }
  0x19   :  { %260 = vmatprep.subr.bf16.mxu1 %v307_v2 }
  0x1c   :  { %261 = vmatpush3.bf16.msra.mxu1 %v277_v11 }
  0x1d   :  { %262 = vmatprep.subr.bf16.mxu1 %v307_v2 }
  0x20   :  { %263 = vmatpush3.bf16.msra.mxu1 %v278_v12 }
  0xd9   :  { %v74_v14 = vpop.f32.mrb[0].mxu0 }
  0xda   :  { %v75_v15 = vadd.f32 %v220_v13, %v74_v14  ;;  %v246_v16 = vpop.f32.mrb[1].mxu0 }
  0xdb   :  { %v77_v17 = vpop.f32.mrb[2].mxu0 }
  0xdc   :  { %v80_v18 = vmax.f32 %v75_v15, 0.0  ;;  %v247_v19 = vpop.f32.mrb[3].mxu0 }
  0xde   :  { %v81_v20 = vpack.c.bf16 %v80_v18, %v80_v18 }
  0xe0   :  { %265 = vmatmul.mubr.bf16.vlgmr.msra.gmra.mrb[0].mxu1 %v81_v20 }
 0x1b3   :  { %v187_v22 = vpop.f32.mrb[0].mxu1 }
 0x1b4   :  { %v188_v23 = vadd.f32 %v222_v21, %v187_v22  ;;  %v266_v24 = vpop.f32.mrb[1].mxu1 }
 0x1b5   :  { %v190_v25 = vpop.f32.mrb[2].mxu1 }
 0x1b6   :  { %v267_v26 = vpop.f32.mrb[3].mxu1  ;;  %v194_v27 = vsel %vm193_vm3, %v188_v23, -inf }
 0x1b7   :  { %195 = vmax.xlane.f32.xlu0 %v194_v27 }
 0x244   :  { %v196_v28 = vpop.xlane.xlu0 %195 }
 0x245   :  { %v197_v29 = vsub.f32 %v188_v23, %v196_v28 }
 0x247   :  { %v198_v30 = vmul.f32 1.442695, %v197_v29 }
 0x249   :  { %279 = vpow2.f32 %v198_v30 }
 0x253   :  { %v280_v31 = vpop.eup %279 }
 0x254   :  { %v200_v32 = vsel %vm193_vm3, %v280_v31, 0.0 }
 0x255   :  { %201 = vadd.xlane.f32.xlu0 %v200_v32 }
 0x2e2   :  { %v202_v33 = vpop.xlane.xlu0 %201 }
 0x2e3   :  { %281 = vrcp.f32 %v202_v33 }
 0x2ed   :  { %v282_v34 = vpop.eup %281 }
 0x2ee   :  { %v204_v35 = vmul.f32 %v282_v34, %v280_v31 }
 0x2f0   :  { %205 = vst.msk [vmem:[#allocation2] sm:$0xff] %vm193_vm3, %v204_v35 }
 0x2f1   :  { %294 = shalt.err (!%p291_p4)
}
 0x2f2   :  { %s295_s17 = scalar_lea.hbm %s396_s5, 128 }
 0x2f3   :  { %p296_p5 = scmp.ne.s32.totalorder %s396_s5, %s295_s17  ;;  %p299_p6 = scmp.lt.u32.totalorder %s295_s17, %s396_s5 }
 0x2f5   :  { %p301_p7 = pnand %p299_p6, %p296_p5 }
 0x2f7   :  { %304 = shalt.err (!%p301_p7)
}
 0x2f8   :  { %215 = dma.vmem_to_hbm [thread:$0]  %s213_s3, 128, %s396_s5, [#allocation3]  }
 0x2f9   :  { %305 = dma.done.wait [#allocation3], 128  }
 0x2fa   :  { %306 = vsyncadd [#allocation3], 4294967168 }
 0x2fb   :  { %219 = vsyncpa [#allocation3], 1 }

</bundles_post_ra>
